<compile_context>
chip_gen: v7x
topology: tpu7x:2x2x1
jax: 0.10.0
libtpu: 0.0.40
codegen_flags: <defaults>
</compile_context>

<pallas_src>
import math

import jax
import jax.numpy as jnp
from jax.experimental import pallas as pl
from jax.experimental.pallas import tpu as pltpu


def data_embedding_kernel(x_ref, w_ref, peb_ref, o_ref):
    # x_ref  : (TB, L, D_in)   streamed input chunk
    # w_ref  : (D_in, Dp)      value-embedding weight (resident, lane-padded)
    # peb_ref: (L, Dp)         positional encoding with bias folded in (resident, f32)
    # o_ref  : (TB, L, Dp)     streamed output chunk
    TB, L, D_in = x_ref.shape
    Dp = w_ref.shape[1]
    # One MXU matmul over all TB*L rows of this chunk, f32 accumulation.
    x2 = x_ref[...].reshape(TB * L, D_in)
    y = jnp.dot(x2, w_ref[...], preferred_element_type=jnp.float32)  # (TB*L, Dp)
    y = y.reshape(TB, L, Dp) + peb_ref[...]        # PE(+bias) broadcast over TB
    # TODO(synk): training-mode dropout (p=0.1) not applied; eval/identity semantics.
    o_ref[...] = y.astype(o_ref.dtype)


def _choose_batch_tile(B, L, rows_per_step=1024):
    """Largest divisor of B giving ~rows_per_step rows/step while keeping >=2 steps."""
    tb = max(1, min(B, rows_per_step // max(L, 1)))
    while B % tb:
        tb -= 1
    if B >= 2 and B // tb < 2:   # keep >=2 parallel grid steps (v7x has 2 TCs/chip)
        tb = max(d for d in range(1, B // 2 + 1) if B % d == 0)
    return tb


def data_embedding(x, w_t, b, pe, *, rows_per_step=1024):
    """x: (B, L, D_in), w_t: (D_in, D_model), b: (D_model,), pe: (L, D_model)."""
    B, L, D_in = x.shape
    D_model = w_t.shape[1]

    # Lane-dense output: round d_model up to a multiple of 128; pad weight and
    # PE table, slice the result afterwards.
    Dp = ((D_model + 127) // 128) * 128
    pad = Dp - D_model

    # Fold bias into the PE table once (static, shared across batch); keep f32.
    peb = pe.astype(jnp.float32) + b.astype(jnp.float32)[None, :]
    w_p = w_t
    if pad:
        w_p = jnp.pad(w_p, ((0, 0), (0, pad)))
        peb = jnp.pad(peb, ((0, 0), (0, pad)))

    TB = _choose_batch_tile(B, L, rows_per_step)
    grid = (B // TB,)

    out = pl.pallas_call(
        data_embedding_kernel,
        out_shape=jax.ShapeDtypeStruct((B, L, Dp), x.dtype),
        grid_spec=pltpu.PrefetchScalarGridSpec(
            num_scalar_prefetch=0,
            grid=grid,
            in_specs=[
                pl.BlockSpec((TB, L, D_in), lambda bi: (bi, 0, 0)),   # streamed
                pl.BlockSpec((D_in, Dp), lambda bi: (0, 0)),          # resident
                pl.BlockSpec((L, Dp), lambda bi: (0, 0)),             # resident
            ],
            out_specs=pl.BlockSpec((TB, L, Dp), lambda bi: (bi, 0, 0)),
        ),
        compiler_params=pltpu.CompilerParams(
            dimension_semantics=("parallel",)),
    )(x, w_p, peb)

    return out[..., :D_model] if pad else out


def make_positional_encoding(seq_len, d_model, dtype=jnp.float32):
    """Sin/cos PE table identical to the PyTorch PositionalEncoding buffer."""
    position = jnp.arange(0, seq_len, dtype=jnp.float32)[:, None]           # (L, 1)
    div_term = jnp.exp(jnp.arange(0, d_model, 2, dtype=jnp.float32)
                       * (-(math.log(10000.0) / d_model)))                  # (D/2,)
    angles = position * div_term                                            # (L, D/2)
    pe = jnp.zeros((seq_len, d_model), dtype=jnp.float32)
    pe = pe.at[:, 0::2].set(jnp.sin(angles))
    pe = pe.at[:, 1::2].set(jnp.cos(angles))
    return pe.astype(dtype)


def init_linear_params(key, input_dim, d_model, dtype=jnp.float32):
    """Deterministic init matching nn.Linear's shapes (weight stored transposed)."""
    kw, kb = jax.random.split(key)
    bound = 1.0 / math.sqrt(input_dim)
    w_t = jax.random.uniform(kw, (input_dim, d_model), dtype,
                             minval=-bound, maxval=bound)
    b = jax.random.uniform(kb, (d_model,), dtype, minval=-bound, maxval=bound)
    return w_t, b


if __name__ == "__main__":
    # Small shapes consistent with the module's forward: (B, L, input_dim)
    B, L, INPUT_DIM, D_MODEL = 2, 8, 4, 32

    key = jax.random.PRNGKey(0)
    kx, kp = jax.random.split(key)

    x = jax.random.normal(kx, (B, L, INPUT_DIM), dtype=jnp.float32)
    w_t, b = init_linear_params(kp, INPUT_DIM, D_MODEL)
    pe = make_positional_encoding(L, D_MODEL)

    out = data_embedding(x, w_t, b, pe)
    out = jax.block_until_ready(out)

    # Reference check in plain JAX (same math, eval-mode dropout = identity).
    ref = x @ w_t + b[None, None, :] + pe[None, :, :]
    assert out.shape == (B, L, D_MODEL)
    assert jnp.allclose(out, ref, atol=1e-5, rtol=1e-5)

    print("KERNEL_OK")
</pallas_src>

<mosaic_0001>
module attributes {stable_mosaic.version = 11 : i64} {
  func.func @data_embedding_kernel(%arg0: i32, %arg1: memref<1x8x4xf32, #tpu.memory_space<vmem>>, %arg2: memref<4x128xf32, #tpu.memory_space<vmem>>, %arg3: memref<8x128xf32, #tpu.memory_space<vmem>>, %arg4: memref<1x8x128xf32, #tpu.memory_space<vmem>>) attributes {dimension_semantics = [#tpu.dimension_semantics<parallel>], iteration_bounds = array<i64: 2>, scalar_prefetch = 0 : i64, scratch_operands = 0 : i64, tpu.core_type = #tpu.core_type<tc>, window_params = [{transform_indices = @transform_0, window_bounds = array<i64: 1, 8, 4>}, {pipeline_mode = #tpu.pipeline_mode<synchronous>, transform_indices = @transform_1, window_bounds = array<i64: 4, 128>}, {pipeline_mode = #tpu.pipeline_mode<synchronous>, transform_indices = @transform_2, window_bounds = array<i64: 8, 128>}, {transform_indices = @transform_3, window_bounds = array<i64: 1, 8, 128>}]} {
    %c0 = arith.constant 0 : index
    %c0_0 = arith.constant 0 : index
    %c0_1 = arith.constant 0 : index
    %0 = vector.load %arg1[%c0, %c0_0, %c0_1] : memref<1x8x4xf32, #tpu.memory_space<vmem>>, vector<1x8x4xf32>
    %1 = vector.shape_cast %0 : vector<1x8x4xf32> to vector<8x4xf32>
    %c0_2 = arith.constant 0 : index
    %c0_3 = arith.constant 0 : index
    %2 = vector.load %arg2[%c0_2, %c0_3] : memref<4x128xf32, #tpu.memory_space<vmem>>, vector<4x128xf32>
    %cst = arith.constant dense<0.000000e+00> : vector<8x128xf32>
    %3 = tpu.matmul %1, %2, %cst {dimension_numbers = #tpu.dot_dimension_numbers<[1], [0], [0], [1], [0, 0, 1, 1], [], []>} : vector<8x4xf32>, vector<4x128xf32>, vector<8x128xf32> -> vector<8x128xf32>
    %4 = vector.shape_cast %3 : vector<8x128xf32> to vector<1x8x128xf32>
    %c0_4 = arith.constant 0 : index
    %c0_5 = arith.constant 0 : index
    %5 = vector.load %arg3[%c0_4, %c0_5] : memref<8x128xf32, #tpu.memory_space<vmem>>, vector<8x128xf32>
    %6 = vector.shape_cast %5 : vector<8x128xf32> to vector<1x8x128xf32>
    %7 = arith.addf %4, %6 : vector<1x8x128xf32>
    %c0_6 = arith.constant 0 : index
    %c0_7 = arith.constant 0 : index
    %c0_8 = arith.constant 0 : index
    %8 = vector.load %arg4[%c0_6, %c0_7, %c0_8] : memref<1x8x128xf32, #tpu.memory_space<vmem>>, vector<1x8x128xf32>
    tpu.vector_store %arg4[%c0_6, %c0_7, %c0_8], %7 {strides = array<i32>} : memref<1x8x128xf32, #tpu.memory_space<vmem>>, vector<1x8x128xf32>,
    return
  }
  func.func @transform_0(%arg0: i32) -> (i32, i32, i32) {
    %c0_i32 = arith.constant 0 : i32
    %c0_i32_0 = arith.constant 0 : i32
    %c0_i32_1 = arith.constant 0 : i32
    return %arg0, %c0_i32, %c0_i32_0 : i32, i32, i32
  }
  func.func @transform_1(%arg0: i32) -> (i32, i32) {
    %c0_i32 = arith.constant 0 : i32
    %c0_i32_0 = arith.constant 0 : i32
    %c0_i32_1 = arith.constant 0 : i32
    return %c0_i32, %c0_i32_0 : i32, i32
  }
  func.func @transform_2(%arg0: i32) -> (i32, i32) {
    %c0_i32 = arith.constant 0 : i32
    %c0_i32_0 = arith.constant 0 : i32
    %c0_i32_1 = arith.constant 0 : i32
    return %c0_i32, %c0_i32_0 : i32, i32
  }
  func.func @transform_3(%arg0: i32) -> (i32, i32, i32) {
    %c0_i32 = arith.constant 0 : i32
    %c0_i32_0 = arith.constant 0 : i32
    %c0_i32_1 = arith.constant 0 : i32
    return %arg0, %c0_i32, %c0_i32_0 : i32, i32, i32
  }
}

</mosaic_0001>

<bundles_post_ra>
// kernel: tpu_custom_call.1
= control target key start
LH: loop header
LB: loop body
LE: loop exit
PB: predicated region body
PF: predicated region fallthrough
CT: control target
= control target key end

     0   :  { %8 = vsyncpa [#allocation3], 0  ;;  %s575_s0 = inlined_call_operand.vmem [shape: f32[2,8,4], index: 0, kind: input, shape index: {}]   ;;  %s576_s1 = inlined_call_operand.vmem [shape: f32[4,128], index: 1, kind: input, shape index: {}]   ;;  %s577_s2 = inlined_call_operand.vmem [shape: f32[8,128], index: 2, kind: input, shape index: {}]   ;;  %s578_s3 = inlined_call_operand.hbm [shape: f32[2,8,128], index: 3, kind: output, shape index: {}]  }
   0x1   :  { %10 = vsyncpa [#allocation3 + $0x1], 0  ;;  %s469_s12 = smov 0   ;;  %s471_s13 = smov 0  }
   0x2   :  { %s473_s14 = smov 0   ;;  %s475_s15 = smov 0  }
   0x3 LB: > { %s490_s16 = sadd.s32 4294967295, %s444_s15   ;;  %s322_s17 = sadd.s32 4294967294, %s444_s15   ;;  %s444_s15 = sphi %s475_s15, %s584_s15   ;;  %s440_s14 = sphi %s473_s14, %s583_s14   ;;  %s436_s13 = sphi %s471_s13, %s582_s13   ;;  %s432_s12 = sphi %s469_s12, %s581_s12  }
   0x4   : > { %s494_s18 = sadd.s32 1, %s444_s15   ;;  %s91_s19 = sadd.s32 1, %s440_s14 }
   0x5   : > { %s88_s20 = ssub.s32 %s444_s15, %s494_s18  ;;  %p101_p0 = scmp.ne.s32.totalorder %s440_s14, %s436_s13 }
   0x6   : > { %p89_p1 = scmp.eq.s32.totalorder %s88_s20, 0  ;;  %p102_p2 = scmp.eq.s32.totalorder %s490_s16, 1 }
   0x7   : > { %p107_p3 = scmp.ne.s32.totalorder %s436_s13, %s432_s12  ;;  %p108_p4 = scmp.eq.s32.totalorder %s322_s17, 1 }
   0x8   : > { %s505_s21 = scalar_select %p89_p1, %s440_s14, %s91_s19  }
   0x9   : > { %p507_p5 = por %p102_p2, %p101_p0  ;;  %p511_p6 = por %p108_p4, %p107_p3 }
   0xa   : > { %p325_p7 = scmp.ge.s32.totalorder %s444_s15, 1  ;;  %p139_p8 = scmp.lt.s32.totalorder %s444_s15, 3 }
   0xc   : > { %p140_p9 = pnand %p325_p7, %p139_p8 }
   0xd   : > { %v167_v0 = vld [vmem:[%s576_s1] sm:$0xf] (!%p140_p9)  ;;  %vm172_vm0 = vcmask (!%p140_p9), 1043456   ;;  %p162_p10 = scmp.lt.s32.totalorder (!%p140_p9), %s490_s16, 1  ;;  %v446_v1 = vmov (!%p140_p9), 0.0   ;;  %vm447_vm1 = vmmov (!%p140_p9), 0  }
   0xe   : > { %143 = sbr.rel (%p140_p9) target bundleno = 254 (0xfe), region = 32  ;;  %336 = vmatprep.subr.mxu0 (!%p140_p9), %v446_v1  ;;  %338 = vmatprep.mubr.msk.f32.mxu0 (!%p140_p9), %vm447_vm1, %v446_v1  ;;  %vm168_vm2 = vcmask (!%p140_p9), 31744   ;;  %s159_s4 = sand.u32 (!%p140_p9), 1, %s436_s13   ;;  %v246_v3 = vld [vmem:[%s577_s2] sm:$0xff] (!%p140_p9) }
   0xf   : > { %337 = vmatpush3.msk.msra.mxu0 (!%p140_p9), %vm172_vm0, %v167_v0  ;;  %s326_s5 = sshll.u32 (!%p140_p9), %s159_s4, 3  ;;  %s331_s8 = sshll.u32 (!%p140_p9), %s490_s16, 7 }
  0x10   : > { %s161_s9 = scalar_lea.vmem (!%p140_p9), [#allocation2], %s326_s5  ;;  %s533_s19 = scalar_lea.hbm (!%p140_p9), %s578_s3, %s331_s8 }
  0x11   : > { %s263_s10 = sshll.u32 (!%p140_p9), %s161_s9, 4  ;;  %s250_s20 = scalar_lea.sflag (!%p140_p9), [#allocation3], %s159_s4  ;;  %s535_s10 = int_to_ptr.vmem [resolvable:$true] %s263_s10 }
  0x12   : > { %s382_s24 = scalar_lea.vmem (!%p140_p9), %s535_s10, 128 }
  0x13   : > { %p383_p11 = scmp.ne.s32.totalorder (!%p140_p9), %s535_s10, %s382_s24 }
  0x15   : > { %s163_s26 = scalar_select %p162_p10, %s490_s16, 1 }
  0x16   : > { %p384_p12 = pnand %p383_p11, %p507_p5  ;;  %s448_s16 = smov [#allocation2]  }
  0x17   : > { %s327_s27 = sshll.u32 %s163_s26, 3  ;;  %s386_s25 = sshll.u32 %s448_s16, 4  ;;  %s387_s25 = int_to_ptr.vmem [resolvable:$false] %s386_s25 }
  0x18   : > { %s165_s30 = scalar_lea.vmem %s575_s0, %s327_s27  ;;  %p385_p13 = pneg %p384_p12 }
  0x19   : > { %v166_v2 = vld [vmem:[%s165_s30] sm:$0xff]  ;;  %s388_s26 = scalar_lea.vmem %s387_s25, 256  ;;  %p389_p0 = scmp.lt.s32.totalorder %s535_s10, %s387_s25 }
  0x1a   : > { %339 = vmatmul.mubr.msk.f32.vlgmr.msra.gmra.mrb[0].mxu0 %vm168_vm2, %v166_v2  ;;  %p390_p1 = scmp.lt.s32.totalorder %s388_s26, %s382_s24 }
  0x1c   : > { %p391_p2 = por %p390_p1, %p389_p0 }
  0x1e   : > { %p392_p3 = pnand %p391_p2, %p385_p13 }
  0xed   : > { %v242_v4 = vpop.f32.mrb[0].mxu0 }
  0xee   : > { %v247_v5 = vadd.f32 %v246_v3, %v242_v4  ;;  %v340_v6 = vpop.f32.mrb[1].mxu0 }
  0xf0   : > { %248 = vst [vmem:[%s161_s9] sm:$0xff] %v247_v5 }
  0xf1   : > { %395 = shalt.err (!%p392_p3)
}
  0xf2   : > { %s396_s27 = scalar_lea.hbm %s533_s19, 128  ;;  %s400_s30 = scalar_lea.hbm %s578_s3, 256 }
  0xf3   : > { %p397_p4 = scmp.ne.s32.totalorder %s533_s19, %s396_s27  ;;  %p401_p9 = scmp.lt.u32.totalorder %s533_s19, %s578_s3 }
  0xf4   : > { %p402_p10 = scmp.lt.u32.totalorder %s400_s30, %s396_s27  ;;  %p404_p12 = scmp.lt.u32.totalorder %s396_s27, %s533_s19 }
  0xf5   : > { %p398_p7 = pnand %p397_p4, %p507_p5 }
  0xf6   : > { %p403_p11 = por %p402_p10, %p401_p9 }
  0xf7   : > { %p399_p8 = pneg %p398_p7 }
  0xf8   : > { %p405_p13 = por %p404_p12, %p403_p11 }
  0xfa   : > { %p406_p0 = pnand %p405_p13, %p399_p8 }
  0xfc   : > { %409 = shalt.err (!%p406_p0)
}
  0xfd   : > { %341 = dma.vmem_to_hbm [thread:$0]  (%p507_p5), %s535_s10, 128, %s533_s19, %s250_s20  }
  0xfe PF: > { %p347_p1 = scmp.ge.s32.totalorder %s444_s15, 2  ;;  %s275_s6 = sand.u32 1, %s432_s12  }
  0xff   : > { %s276_s7 = scalar_lea.sflag [#allocation3], %s275_s6 }
 0x100   : > { %p344_p2 = pnand %p347_p1, %p511_p6 }
 0x102   : > { %427 = dma.done.wait (!%p344_p2), %s276_s7, 128  }
 0x103   : > { %429 = vsyncadd (!%p344_p2), %s276_s7, 4294967168  ;;  %p13_p3 = scmp.ge.s32.totalorder %s494_s18, 4   ;;  %s581_s12 = smov %s436_s13 }
 0x104   : > { %s582_s13 = smov %s440_s14  ;;  %s583_s14 = smov %s505_s21 }
 0x105   : > { %s584_s15 = smov %s494_s18  ;;  %15 = sbr.rel (!%p13_p3) target bundleno = 3 (0x3), region = 67 }
 0x10c   :  { %281 = vsyncpa [#allocation3], 1 }
 0x10d   :  { %283 = vsyncpa [#allocation3 + $0x1], 1 }

</bundles_post_ra>
